<compile_context>
chip_gen: v5e
topology: v5e:2x2
jax: 0.10.0
libtpu: 0.0.40
codegen_flags: <defaults>
</compile_context>

<pallas_src>
import functools

import jax
import jax.numpy as jnp
from jax import lax
from jax.experimental import pallas as pl
from jax.experimental.pallas import tpu as pltpu

H = 50         # hidden width of the PyTorch module
H_PAD = 56     # sublane-aligned (multiple of 8) padded hidden width
_CHUNK = 128   # in-kernel lane sub-chunk (keeps activations in vregs)


def _mlp_kernel(x_ref, p_ref, w2_ref, o_ref):
    """Transposed (batch-on-lanes) fused 3-layer MLP.

    x_ref : (1, TM)            lane-dense row of input samples (f32)
    p_ref : (H_PAD, 8)  f32    packed params:
                               col0=w1, col1=b1, col2=b2, col3=w3, [0,4]=b3
                               (padded rows 50..55 are zero)
    w2_ref: (H_PAD, H_PAD)     layer-2 weights, stored (out, in), zero-padded,
                               dtype = compute dtype (f32 or bf16)
    o_ref : (1, TM)            lane-dense output row (f32)
    """
    cdt = w2_ref.dtype                         # compute dtype for tanh / MXU
    p = p_ref[...]                             # tiny, grid-resident
    w1c, b1c = p[:, 0:1], p[:, 1:2]            # (H_PAD, 1)
    b2c, w3c = p[:, 2:3], p[:, 3:4]            # (H_PAD, 1)
    b3 = p[0:1, 4:5]                           # (1, 1)
    w2 = w2_ref[...]                           # (H_PAD, H_PAD)

    tm = x_ref.shape[1]
    n_chunks = tm // _CHUNK

    def chunk(c, carry):
        off = pl.multiple_of(c * _CHUNK, _CHUNK)
        x = x_ref[:, pl.ds(off, _CHUNK)]                       # (1, CHUNK) f32

        # Layer 1: K=1 "matmul" == outer product -> plain VPU broadcast mul.
        pre1 = w1c * x + b1c                                   # (H_PAD, CHUNK)
        h1 = jnp.tanh(pre1.astype(cdt))                        # EUP

        # Layer 2: real MXU matmul; batch (lanes) is the large N dimension.
        pre2 = jnp.dot(w2, h1, preferred_element_type=jnp.float32) + b2c
        h2 = jnp.tanh(pre2.astype(cdt))                        # EUP

        # Layer 3: reduction over hidden (sublane) axis -> lane-dense row.
        # TODO(synk): once EUP is no longer the limiter (bf16 path on
        # v6e/v7x), move this onto the otherwise-idle MXU as
        # jnp.dot(w3_row, h2).
        y = jnp.sum(w3c * h2.astype(jnp.float32), axis=0, keepdims=True) + b3
        o_ref[:, pl.ds(off, _CHUNK)] = y.astype(o_ref.dtype)
        return carry

    lax.fori_loop(0, n_chunks, chunk, 0, unroll=True)


def pack_params(w1, b1, w2, b2, w3, b3):
    """One-time (outside the jitted forward) padding / packing of parameters.

    w1 : (1, H)   b1: (1, H)    (weights stored (in, out), PyTorch values)
    w2 : (H, H)   b2: (1, H)
    w3 : (H, 1)   b3: (1, 1)

    Returns:
      p_slab : (H_PAD, 8)  f32  packed small params (padded rows are zero)
      w2_t   : (H_PAD, H_PAD) f32  layer-2 weights stored (out, in)
    """
    p = jnp.zeros((H_PAD, 8), jnp.float32)
    p = p.at[:H, 0].set(w1[0, :].astype(jnp.float32))
    p = p.at[:H, 1].set(b1[0, :].astype(jnp.float32))
    p = p.at[:H, 2].set(b2[0, :].astype(jnp.float32))
    p = p.at[:H, 3].set(w3[:, 0].astype(jnp.float32))
    p = p.at[0, 4].set(jnp.asarray(b3, jnp.float32).reshape(()))
    w2_t = jnp.zeros((H_PAD, H_PAD), jnp.float32).at[:H, :H].set(
        w2.T.astype(jnp.float32))
    return p, w2_t


@functools.partial(jax.jit, static_argnames=("tm", "compute_dtype"))
def neural_net_forward(x, p_slab, w2_t, *, tm=1024, compute_dtype=jnp.float32):
    """Forward pass of NeuralNet.

    x       : (N, 1) float32
    p_slab  : (H_PAD, 8) float32      (from pack_params)
    w2_t    : (H_PAD, H_PAD) float32  (from pack_params)
    tm      : batch tile (lanes) per grid step; multiple of 128.  Pick it so
              the tile count is even (>=2) on v7x (two TensorCores).
    compute_dtype : jnp.float32 (v5e) or jnp.bfloat16 (v6e / v7x).
    returns (N, 1) float32
    """
    assert tm % _CHUNK == 0, "batch tile must be a multiple of 128 lanes"
    n = x.shape[0]
    n_pad = tm * pl.cdiv(n, tm)

    # ---- layout plumbing (wrapper-side, cheap) ------------------------------
    x_row = x.reshape(1, n).astype(jnp.float32)          # batch onto lanes
    if n_pad != n:
        x_row = jnp.pad(x_row, ((0, 0), (0, n_pad - n)))
    w2_c = w2_t.astype(compute_dtype)                    # no-op in f32 path

    full = lambda shape: pl.BlockSpec(shape, lambda i: (0, 0))

    out_row = pl.pallas_call(
        _mlp_kernel,
        out_shape=jax.ShapeDtypeStruct((1, n_pad), jnp.float32),
        grid_spec=pltpu.PrefetchScalarGridSpec(
            num_scalar_prefetch=0,
            grid=(n_pad // tm,),
            in_specs=[
                pl.BlockSpec((1, tm), lambda i: (0, i)),   # x (lane-tiled)
                full((H_PAD, 8)),                          # packed small params
                full((H_PAD, H_PAD)),                      # w2 (out, in)
            ],
            out_specs=pl.BlockSpec((1, tm), lambda i: (0, i)),
        ),
        compiler_params=pltpu.CompilerParams(
            dimension_semantics=("parallel",),
        ),
    )(x_row, p_slab, w2_c)

    return out_row[0, :n].reshape(n, 1)


def init_params(key):
    """Deterministic init matching PyTorch Linear's default:
    U(-1/sqrt(fan_in), 1/sqrt(fan_in)) for both weight and bias.
    Weights stored as (in, out)."""
    ks = jax.random.split(key, 6)

    def unif(k, shape, fan_in):
        bound = 1.0 / jnp.sqrt(float(fan_in))
        return jax.random.uniform(k, shape, jnp.float32, -bound, bound)

    w1 = unif(ks[0], (1, H), 1)
    b1 = unif(ks[1], (1, H), 1)
    w2 = unif(ks[2], (H, H), H)
    b2 = unif(ks[3], (1, H), H)
    w3 = unif(ks[4], (H, 1), H)
    b3 = unif(ks[5], (1, 1), H)
    return w1, b1, w2, b2, w3, b3


def reference_forward(x, w1, b1, w2, b2, w3, b3):
    h1 = jnp.tanh(x @ w1 + b1)
    h2 = jnp.tanh(h1 @ w2 + b2)
    return h2 @ w3 + b3


if __name__ == "__main__":
    key = jax.random.PRNGKey(0)
    k_x, k_p = jax.random.split(key)

    # Small test shapes: 512 samples, tm=256 -> grid=(2,) (even tile count,
    # keeps both v7x TCs busy), 2 unrolled 128-lane sub-chunks per tile.
    N, TM = 512, 256
    x = jax.random.normal(k_x, (N, 1), dtype=jnp.float32)
    raw_params = init_params(k_p)
    p_slab, w2_t = pack_params(*raw_params)

    ref = reference_forward(x, *raw_params)

    # f32 compute path (use this on v5e).
    out_f32 = jax.block_until_ready(neural_net_forward(x, p_slab, w2_t, tm=TM))
    assert out_f32.shape == (N, 1)
    assert jnp.allclose(out_f32, ref, atol=1e-5, rtol=1e-5), "f32 mismatch"

    # bf16 compute path (recommended on v6e / v7x: bf16 EUP/VPU/MXU).
    out_bf16 = jax.block_until_ready(
        neural_net_forward(x, p_slab, w2_t, tm=TM, compute_dtype=jnp.bfloat16))
    assert out_bf16.shape == (N, 1)
    assert jnp.allclose(out_bf16, ref, atol=5e-2, rtol=5e-2), "bf16 mismatch"

    print("KERNEL_OK")
</pallas_src>

<mosaic_0001>
module attributes {stable_mosaic.version = 11 : i64} {
  func.func @_mlp_kernel(%arg0: i32, %arg1: memref<1x256xf32, #tpu.memory_space<vmem>>, %arg2: memref<56x8xf32, #tpu.memory_space<vmem>>, %arg3: memref<56x56xf32, #tpu.memory_space<vmem>>, %arg4: memref<1x256xf32, #tpu.memory_space<vmem>>) attributes {dimension_semantics = [#tpu.dimension_semantics<parallel>], iteration_bounds = array<i64: 2>, scalar_prefetch = 0 : i64, scratch_operands = 0 : i64, tpu.core_type = #tpu.core_type<tc>, window_params = [{transform_indices = @transform_0, window_bounds = array<i64: 1, 256>}, {pipeline_mode = #tpu.pipeline_mode<synchronous>, transform_indices = @transform_1, window_bounds = array<i64: 56, 8>}, {pipeline_mode = #tpu.pipeline_mode<synchronous>, transform_indices = @transform_2, window_bounds = array<i64: 56, 56>}, {transform_indices = @transform_3, window_bounds = array<i64: 1, 256>}]} {
    %c0 = arith.constant 0 : index
    %c0_0 = arith.constant 0 : index
    %0 = vector.load %arg2[%c0, %c0_0] : memref<56x8xf32, #tpu.memory_space<vmem>>, vector<56x8xf32>
    %1 = vector.extract_strided_slice %0 {offsets = [0, 0], sizes = [56, 1], strides = [1, 1]} : vector<56x8xf32> to vector<56x1xf32>
    %2 = vector.extract_strided_slice %0 {offsets = [0, 1], sizes = [56, 1], strides = [1, 1]} : vector<56x8xf32> to vector<56x1xf32>
    %3 = vector.extract_strided_slice %0 {offsets = [0, 2], sizes = [56, 1], strides = [1, 1]} : vector<56x8xf32> to vector<56x1xf32>
    %4 = vector.extract_strided_slice %0 {offsets = [0, 3], sizes = [56, 1], strides = [1, 1]} : vector<56x8xf32> to vector<56x1xf32>
    %5 = vector.extract_strided_slice %0 {offsets = [0, 4], sizes = [1, 1], strides = [1, 1]} : vector<56x8xf32> to vector<1x1xf32>
    %c0_1 = arith.constant 0 : index
    %c0_2 = arith.constant 0 : index
    %6 = vector.load %arg3[%c0_1, %c0_2] : memref<56x56xf32, #tpu.memory_space<vmem>>, vector<56x56xf32>
    %c0_i32 = arith.constant 0 : i32
    %c128_i32 = arith.constant 128 : i32
    %7 = arith.muli %c0_i32, %c128_i32 : i32
    %8 = tpu.assume_multiple %7, 128 : i32
    %c0_3 = arith.constant 0 : index
    %9 = arith.index_cast %8 : i32 to index
    %10 = vector.load %arg1[%c0_3, %9] : memref<1x256xf32, #tpu.memory_space<vmem>>, vector<1x128xf32>
    %11 = vector.broadcast %1 : vector<56x1xf32> to vector<56x128xf32>
    %12 = vector.broadcast %10 : vector<1x128xf32> to vector<56x128xf32>
    %13 = arith.mulf %11, %12 : vector<56x128xf32>
    %14 = vector.broadcast %2 : vector<56x1xf32> to vector<56x128xf32>
    %15 = arith.addf %13, %14 : vector<56x128xf32>
    %16 = math.tanh %15 : vector<56x128xf32>
    %cst = arith.constant dense<0.000000e+00> : vector<56x128xf32>
    %17 = tpu.matmul %6, %16, %cst {dimension_numbers = #tpu.dot_dimension_numbers<[1], [0], [0], [1], [0, 0, 1, 1], [], []>} : vector<56x56xf32>, vector<56x128xf32>, vector<56x128xf32> -> vector<56x128xf32>
    %18 = vector.broadcast %3 : vector<56x1xf32> to vector<56x128xf32>
    %19 = arith.addf %17, %18 : vector<56x128xf32>
    %20 = math.tanh %19 : vector<56x128xf32>
    %21 = vector.broadcast %4 : vector<56x1xf32> to vector<56x128xf32>
    %22 = arith.mulf %21, %20 : vector<56x128xf32>
    %cst_4 = arith.constant dense<0.000000e+00> : vector<128xf32>
    %23 = vector.multi_reduction <add>, %22, %cst_4 [0] : vector<56x128xf32> to vector<128xf32>
    %24 = vector.shape_cast %23 : vector<128xf32> to vector<1x128xf32>
    %25 = vector.broadcast %5 : vector<1x1xf32> to vector<1x128xf32>
    %26 = arith.addf %24, %25 : vector<1x128xf32>
    %c0_5 = arith.constant 0 : index
    %27 = arith.index_cast %8 : i32 to index
    %28 = vector.load %arg4[%c0_5, %27] : memref<1x256xf32, #tpu.memory_space<vmem>>, vector<1x128xf32>
    tpu.vector_store %arg4[%c0_5, %27], %26 {strides = array<i32>} : memref<1x256xf32, #tpu.memory_space<vmem>>, vector<1x128xf32>,
    %c1_i32 = arith.constant 1 : i32
    %c128_i32_6 = arith.constant 128 : i32
    %29 = arith.muli %c1_i32, %c128_i32_6 : i32
    %30 = tpu.assume_multiple %29, 128 : i32
    %c0_7 = arith.constant 0 : index
    %31 = arith.index_cast %30 : i32 to index
    %32 = vector.load %arg1[%c0_7, %31] : memref<1x256xf32, #tpu.memory_space<vmem>>, vector<1x128xf32>
    %33 = vector.broadcast %1 : vector<56x1xf32> to vector<56x128xf32>
    %34 = vector.broadcast %32 : vector<1x128xf32> to vector<56x128xf32>
    %35 = arith.mulf %33, %34 : vector<56x128xf32>
    %36 = vector.broadcast %2 : vector<56x1xf32> to vector<56x128xf32>
    %37 = arith.addf %35, %36 : vector<56x128xf32>
    %38 = math.tanh %37 : vector<56x128xf32>
    %cst_8 = arith.constant dense<0.000000e+00> : vector<56x128xf32>
    %39 = tpu.matmul %6, %38, %cst_8 {dimension_numbers = #tpu.dot_dimension_numbers<[1], [0], [0], [1], [0, 0, 1, 1], [], []>} : vector<56x56xf32>, vector<56x128xf32>, vector<56x128xf32> -> vector<56x128xf32>
    %40 = vector.broadcast %3 : vector<56x1xf32> to vector<56x128xf32>
    %41 = arith.addf %39, %40 : vector<56x128xf32>
    %42 = math.tanh %41 : vector<56x128xf32>
    %43 = vector.broadcast %4 : vector<56x1xf32> to vector<56x128xf32>
    %44 = arith.mulf %43, %42 : vector<56x128xf32>
    %cst_9 = arith.constant dense<0.000000e+00> : vector<128xf32>
    %45 = vector.multi_reduction <add>, %44, %cst_9 [0] : vector<56x128xf32> to vector<128xf32>
    %46 = vector.shape_cast %45 : vector<128xf32> to vector<1x128xf32>
    %47 = vector.broadcast %5 : vector<1x1xf32> to vector<1x128xf32>
    %48 = arith.addf %46, %47 : vector<1x128xf32>
    %c0_10 = arith.constant 0 : index
    %49 = arith.index_cast %30 : i32 to index
    %50 = vector.load %arg4[%c0_10, %49] : memref<1x256xf32, #tpu.memory_space<vmem>>, vector<1x128xf32>
    tpu.vector_store %arg4[%c0_10, %49], %48 {strides = array<i32>} : memref<1x256xf32, #tpu.memory_space<vmem>>, vector<1x128xf32>,
    %c2_i32 = arith.constant 2 : i32
    return
  }
  func.func @transform_0(%arg0: i32) -> (i32, i32) {
    %c0_i32 = arith.constant 0 : i32
    %c0_i32_0 = arith.constant 0 : i32
    return %c0_i32, %arg0 : i32, i32
  }
  func.func @transform_1(%arg0: i32) -> (i32, i32) {
    %c0_i32 = arith.constant 0 : i32
    %c0_i32_0 = arith.constant 0 : i32
    %c0_i32_1 = arith.constant 0 : i32
    return %c0_i32, %c0_i32_0 : i32, i32
  }
  func.func @transform_2(%arg0: i32) -> (i32, i32) {
    %c0_i32 = arith.constant 0 : i32
    %c0_i32_0 = arith.constant 0 : i32
    %c0_i32_1 = arith.constant 0 : i32
    return %c0_i32, %c0_i32_0 : i32, i32
  }
  func.func @transform_3(%arg0: i32) -> (i32, i32) {
    %c0_i32 = arith.constant 0 : i32
    %c0_i32_0 = arith.constant 0 : i32
    return %c0_i32, %arg0 : i32, i32
  }
}

</mosaic_0001>

<bundles_post_ra>
// kernel: neural_net_forward.1
= control target key start
LH: loop header
LB: loop body
LE: loop exit
PB: predicated region body
PF: predicated region fallthrough
CT: control target
= control target key end

     0   :  { %8 = vsyncpa [#allocation3], 0  ;;  %s1037_s0 = inlined_call_operand.vmem [shape: f32[1,512], index: 0, kind: input, shape index: {}]   ;;  %s1038_s1 = inlined_call_operand.vmem [shape: f32[56,8], index: 1, kind: input, shape index: {}]   ;;  %s1039_s2 = inlined_call_operand.vmem [shape: f32[56,56], index: 2, kind: input, shape index: {}]   ;;  %s1040_s3 = inlined_call_operand.hbm [shape: f32[1,512], index: 3, kind: output, shape index: {}]  }
   0x1   :  { %10 = vsyncpa [#allocation3 + $0x1], 0  ;;  %s836_s12 = smov 0   ;;  %s838_s13 = smov 0  }
   0x2   :  { %s840_s14 = smov 0   ;;  %s842_s15 = smov 0  }
   0x3 LB: > { %s587_s16 = sadd.s32 4294967295, %s809_s15   ;;  %s588_s17 = sadd.s32 4294967294, %s809_s15   ;;  %s809_s15 = sphi %s842_s15, %s1046_s15   ;;  %s805_s14 = sphi %s840_s14, %s1045_s14   ;;  %s801_s13 = sphi %s838_s13, %s1044_s13   ;;  %s797_s12 = sphi %s836_s12, %s1043_s12  }
   0x4   : > { %s859_s18 = sadd.s32 1, %s809_s15   ;;  %s91_s19 = sadd.s32 1, %s805_s14 }
   0x5   : > { %s88_s20 = ssub.s32 %s809_s15, %s859_s18  ;;  %p101_p0 = scmp.ne.s32.totalorder %s805_s14, %s801_s13 }
   0x6   : > { %p89_p1 = scmp.eq.s32.totalorder %s88_s20, 0  ;;  %p102_p2 = scmp.eq.s32.totalorder %s587_s16, 1 }
   0x7   : > { %p107_p3 = scmp.ne.s32.totalorder %s801_s13, %s797_s12  ;;  %p108_p4 = scmp.eq.s32.totalorder %s588_s17, 1 }
   0x8   : > { %s869_s21 = scalar_select %p89_p1, %s805_s14, %s91_s19  }
   0x9   : > { %p871_p5 = por %p102_p2, %p101_p0  ;;  %p875_p6 = por %p108_p4, %p107_p3 }
   0xa   : > { %p591_p7 = scmp.ge.s32.totalorder %s809_s15, 1  ;;  %p140_p8 = scmp.lt.s32.totalorder %s809_s15, 3 }
   0xc   : > { %p141_p9 = pnand %p591_p7, %p140_p8 }
   0xd   : > { %s886_s26 = sshll.u32 (!%p141_p9), %s587_s16, 1  ;;  %s160_s16 = sand.u32 (!%p141_p9), 1, %s801_s13  }
   0xe   : > { %144 = sbr.rel (%p141_p9) target bundleno = 370 (0x172), region = 32  ;;  %p164_p10 = scmp.lt.s32.totalorder (!%p141_p9), %s886_s26, 3 }
   0xf   : > { %s592_s17 = sshll.u32 (!%p141_p9), %s160_s16, 1  ;;  %s527_s24 = scalar_lea.hbm (!%p141_p9), %s1040_s3, %s886_s26 }
  0x10   : > { %s162_s25 = scalar_lea.vmem (!%p141_p9), [#allocation2], %s592_s17  ;;  %s531_s28 = sshll.u32 (!%p141_p9), %s527_s24, 4  ;;  %s532_s28 = int_to_ptr.hbm [resolvable:$true] %s531_s28 }
  0x11   : > { %s529_s27 = sshll.u32 (!%p141_p9), %s162_s25, 4  ;;  %s761_s30 = sshra.s32 (!%p141_p9), %s532_s28, 4  ;;  %s530_s27 = int_to_ptr.vmem [resolvable:$true] %s529_s27  ;;  %s762_s30 = int_to_ptr.hbm [resolvable:$true] %s761_s30 }
  0x12   : > { %s767_s6 = scalar_lea.hbm (!%p141_p9), %s1040_s3, 4  ;;  %p768_p0 = scmp.lt.s32.totalorder (!%p141_p9), %s762_s30, %s1040_s3 }
  0x13   : > { %v884_v0 = vld [vmem:[%s1038_s1 + $0x30] sm:$0xff]  ;;  %v811_v1 = vmov 1   ;;  %v812_v2 = vmov 0   ;;  %v894_v3 = vld [vmem:[%s1038_s1 + $0x28] sm:$0xff]  ;;  %s165_s29 = scalar_select %p164_p10, %s886_s26, 3  ;;  %v904_v4 = vld [vmem:[%s1038_s1 + $0x20] sm:$0xff] }
  0x14   : > { %673 = vset.pattern.permute.xlu1 %v811_v1  ;;  %672 = vset.pattern.permute.xlu0 %v812_v2  ;;  %v910_v5 = vld [vmem:[%s1038_s1 + $0x18] sm:$0xff]  ;;  %v917_v6 = vld [vmem:[%s1038_s1 + $0x10] sm:$0xff]  ;;  %v925_v7 = vld [vmem:[%s1038_s1 + $0x8] sm:$0xff]  ;;  %v813_v15 = vmov 2   ;;  %vm299_vm0 = vcmask 457728   ;;  %s763_s26 = scalar_lea.hbm %s762_s30, 2 }
  0x15   : > { %254 = vperm.xlu1 %673, %v884_v0   ;;  %216 = vperm.xlu0 %672, %v884_v0   ;;  %s166_s5 = scalar_lea.vmem %s1037_s0, %s165_s29  ;;  %v930_v8 = vld [vmem:[%s1038_s1] sm:$0xff]  ;;  %s517_s29 = scalar_lea.sflag [#allocation3], %s160_s16 }
  0x16   : > { %675 = vset.pattern.permute.xlu2 %v811_v1  ;;  %v937_v10 = vld [vmem:[%s166_s5] ss:$0 sm:$0xff]  ;;  %v939_v11 = vld [vmem:[%s166_s5 + $0x1] ss:$0 sm:$0xff]  ;;  %p764_p11 = scmp.ne.s32.totalorder %s762_s30, %s763_s26  ;;  %p769_p1 = scmp.lt.s32.totalorder %s767_s6, %s763_s26 }
  0x17   : > { %250 = vperm.xlu2 %675, %v894_v3  }
  0x18   : > { %p765_p12 = pnand %p764_p11, %p871_p5  ;;  %p770_p2 = por %p769_p1, %p768_p0 }
  0x1a   : > { %p766_p13 = pneg %p765_p12 }
  0x1c   : > { %p771_p3 = pnand %p770_p2, %p766_p13 }
  0x1d   : > { %674 = vset.pattern.permute.xlu1 %v812_v2  ;;  %211 = vperm.xlu0 %672, %v894_v3  }
  0x1e   : > { %206 = vperm.xlu1 %674, %v904_v4  }
  0x1f   : > { %676 = vset.pattern.permute.xlu2 %v812_v2 }
  0x20   : > { %201 = vperm.xlu2 %676, %v910_v5  }
  0x25   : > { %677 = vset.pattern.permute.xlu0 %v811_v1 }
  0x26   : > { %246 = vperm.xlu0 %677, %v904_v4   ;;  %196 = vperm.xlu1 %674, %v917_v6  }
  0x28   : > { %678 = vset.pattern.permute.xlu2 %v811_v1 }
  0x29   : > { %242 = vperm.xlu2 %678, %v910_v5  }
  0x2e   : > { %679 = vset.pattern.permute.xlu0 %v812_v2  ;;  %191 = vperm.xlu1 %674, %v925_v7  }
  0x2f   : > { %186 = vperm.xlu0 %679, %v930_v8  }
  0x31   : > { %238 = vperm.xlu2 %678, %v917_v6  }
  0x36   : > { %680 = vset.pattern.permute.xlu1 %v811_v1  ;;  %v814_v1 = vmov 3  }
  0x37   : > { %234 = vperm.xlu1 %680, %v925_v7   ;;  %683 = vset.pattern.permute.xlu0 %v813_v15 }
  0x38   : > { %280 = vperm.xlu0 %683, %v917_v6  }
  0x39   : > { %230 = vperm.xlu2 %678, %v930_v8  }
  0x3f   : > { %681 = vset.pattern.permute.xlu1 %v813_v15 }
  0x40   : > { %272 = vperm.xlu1 %681, %v930_v8   ;;  %685 = vset.pattern.permute.xlu0 %v814_v1 }
  0x41   : > { %682 = vset.pattern.permute.xlu2 %v813_v15  ;;  %371 = vperm.xlu0 %685, %v925_v7   ;;  %v182_v15 = vld [vmem:[%s1039_s2 + $0x30] sm:$0xff] }
  0x42   : > { %276 = vperm.xlu2 %682, %v925_v7   ;;  %v177_v7 = vld [vmem:[%s1039_s2 + $0x8] sm:$0xff] }
  0x48   : > { %284 = vperm.xlu1 %681, %v910_v5  }
  0x49   : > { %387 = vperm.xlu0 %685, %v894_v3  }
  0x4a   : > { %288 = vperm.xlu2 %682, %v904_v4  }
  0x50   : > { %292 = vperm.xlu1 %681, %v894_v3   ;;  %v815_v3 = vmov 4  }
  0x51   : > { %688 = vset.pattern.permute.xlu0 %v815_v3 }
  0x52   : > { %684 = vset.pattern.permute.xlu2 %v814_v1 }
  0x53   : > { %367 = vperm.xlu2 %684, %v930_v8  }
  0x58   : > { %296 = vperm.xlu1 %681, %v884_v0  }
  0x5b   : > { %375 = vperm.xlu2 %684, %v917_v6  }
  0x60   : > { %686 = vset.pattern.permute.xlu1 %v814_v1 }
  0x61   : > { %379 = vperm.xlu1 %686, %v910_v5   ;;  %v180_v5 = vld [vmem:[%s1039_s2 + $0x20] sm:$0xff] }
  0x63   : > { %383 = vperm.xlu2 %684, %v904_v4  }
  0x69   : > { %391 = vperm.xlu1 %686, %v884_v0   ;;  %v178_v0 = vld [vmem:[%s1039_s2 + $0x10] sm:$0xff] }
  0x6b   : > { %687 = vset.pattern.permute.xlu2 %v815_v3 }
  0x6c   : > { %414 = vperm.xlu2 %687, %v930_v8  }
  0x71   : > { %v251_v9 = vpop.permute.xlu2 %250 }
  0x7a   : > { %v202_v12 = vpop.permute.xlu2 %201 }
  0x7b   : > { %v225_v29 = vmul.f32 %v937_v10, %v202_v12  ;;  %v431_v30 = vmul.f32 %v939_v11, %v202_v12  ;;  %v179_v12 = vld [vmem:[%s1039_s2 + $0x18] sm:$0xff] }
  0x83   : > { %v243_v21 = vpop.permute.xlu2 %242 }
  0x84   : > { %v260_v33 = vadd.f32 %v243_v21, %v225_v29  ;;  %v438_v41 = vadd.f32 %v431_v30, %v243_v21 }
  0x87   : > { %v255_v13 = vpop.permute.xlu1 %254  ;;  %v217_v14 = vpop.permute.xlu0 %216 }
  0x88   : > { %v228_v16 = vmul.f32 %v937_v10, %v217_v14  ;;  %v434_v17 = vmul.f32 %v939_v11, %v217_v14  ;;  %v181_v14 = vld [vmem:[%s1039_s2 + $0x28] sm:$0xff] }
  0x8a   : > { %v263_v18 = vadd.f32 %v255_v13, %v228_v16  ;;  %v441_v19 = vadd.f32 %v434_v17, %v255_v13 }
  0x8b   : > { %v239_v42 = vpop.permute.xlu2 %238 }
  0x8c   : > { %691 = vtanh.f32 %v263_v18 }
  0x8d   : > { %693 = vtanh.f32 %v441_v19 }
  0x8f   : > { %v212_v20 = vpop.permute.xlu0 %211 }
  0x90   : > { %v227_v22 = vmul.f32 %v937_v10, %v212_v20  ;;  %v433_v23 = vmul.f32 %v939_v11, %v212_v20  ;;  %v207_v24 = vpop.permute.xlu1 %206 }
  0x91   : > { %v226_v31 = vmul.f32 %v937_v10, %v207_v24  ;;  %v432_v32 = vmul.f32 %v939_v11, %v207_v24 }
  0x92   : > { %v692_v25 = vpop.eup %691  ;;  %v262_v26 = vadd.f32 %v251_v9, %v227_v22  ;;  %v440_v27 = vadd.f32 %v433_v23, %v251_v9 }
  0x93   : > { %v694_v28 = vpop.eup %693  ;;  %330 = vmatpush.msra.mxu0 %v692_v25  ;;  %614 = vmatpush.msra.mxu2 %v692_v25  ;;  %v231_v58 = vpop.permute.xlu2 %230 }
  0x94   : > { %695 = vtanh.f32 %v262_v26  ;;  %458 = vmatpush.msra.mxu1 %v694_v28  ;;  %621 = vmatpush.msra.mxu3 %v694_v28 }
  0x95   : > { %697 = vtanh.f32 %v440_v27 }
  0x98   : > { %v247_v34 = vpop.permute.xlu0 %246  ;;  %v197_v35 = vpop.permute.xlu1 %196 }
  0x99   : > { %v261_v36 = vadd.f32 %v247_v34, %v226_v31  ;;  %v439_v37 = vadd.f32 %v432_v32, %v247_v34  ;;  %v224_v38 = vmul.f32 %v937_v10, %v197_v35  ;;  %v430_v39 = vmul.f32 %v939_v11, %v197_v35 }
  0x9a   : > { %v696_v40 = vpop.eup %695 }
  0x9b   : > { %v698_v43 = vpop.eup %697  ;;  %699 = vtanh.f32 %v261_v36  ;;  %v259_v44 = vadd.f32 %v239_v42, %v224_v38  ;;  %331 = vmatpush.msra.mxu0 %v696_v40  ;;  %615 = vmatpush.msra.mxu2 %v696_v40  ;;  %v437_v45 = vadd.f32 %v430_v39, %v239_v42 }
  0x9c   : > { %701 = vtanh.f32 %v439_v37  ;;  %459 = vmatpush.msra.mxu1 %v698_v43  ;;  %622 = vmatpush.msra.mxu3 %v698_v43  ;;  %v277_v16 = vpop.permute.xlu2 %276 }
  0x9d   : > { %703 = vtanh.f32 %v260_v33 }
  0x9e   : > { %705 = vtanh.f32 %v438_v41 }
  0x9f   : > { %707 = vtanh.f32 %v259_v44 }
  0xa0   : > { %709 = vtanh.f32 %v437_v45  ;;  %v192_v46 = vpop.permute.xlu1 %191 }
  0xa1   : > { %v700_v47 = vpop.eup %699  ;;  %v187_v50 = vpop.permute.xlu0 %186  ;;  %v223_v56 = vmul.f32 %v937_v10, %v192_v46  ;;  %v429_v57 = vmul.f32 %v939_v11, %v192_v46 }
  0xa2   : > { %v702_v48 = vpop.eup %701  ;;  %332 = vmatpush.msra.mxu0 %v700_v47  ;;  %616 = vmatpush.msra.mxu2 %v700_v47  ;;  %v222_v54 = vmul.f32 %v937_v10, %v187_v50  ;;  %v428_v55 = vmul.f32 %v939_v11, %v187_v50  ;;  %v176_v11 = vld [vmem:[%s1039_s2] sm:$0xff] }
  0xa3   : > { %v704_v49 = vpop.eup %703  ;;  %460 = vmatpush.msra.mxu1 %v702_v48  ;;  %623 = vmatpush.msra.mxu3 %v702_v48 }
  0xa4   : > { %v706_v51 = vpop.eup %705  ;;  %333 = vmatpush.msra.mxu0 %v704_v49  ;;  %617 = vmatpush.msra.mxu2 %v704_v49  ;;  %v257_v60 = vadd.f32 %v231_v58, %v222_v54  ;;  %v435_v63 = vadd.f32 %v428_v55, %v231_v58  ;;  %v289_v20 = vpop.permute.xlu2 %288 }
  0xa5   : > { %v708_v52 = vpop.eup %707  ;;  %461 = vmatpush.msra.mxu1 %v706_v51  ;;  %624 = vmatpush.msra.mxu3 %v706_v51 }
  0xa6   : > { %v710_v53 = vpop.eup %709  ;;  %334 = vmatpush.msra.mxu0 %v708_v52  ;;  %618 = vmatpush.msra.mxu2 %v708_v52 }
  0xa7   : > { %462 = vmatpush.msra.mxu1 %v710_v53  ;;  %625 = vmatpush.msra.mxu3 %v710_v53 }
  0xa9   : > { %v235_v59 = vpop.permute.xlu1 %234 }
  0xaa   : > { %v258_v61 = vadd.f32 %v235_v59, %v223_v56  ;;  %v436_v62 = vadd.f32 %v429_v57, %v235_v59  ;;  %v281_v27 = vpop.permute.xlu0 %280 }
  0xac   : > { %711 = vtanh.f32 %v258_v61 }
  0xad   : > { %713 = vtanh.f32 %v436_v62  ;;  %v368_v28 = vpop.permute.xlu2 %367 }
  0xae   : > { %715 = vtanh.f32 %v257_v60 }
  0xaf   : > { %717 = vtanh.f32 %v435_v63 }
  0xb2   : > { %v712_v2 = vpop.eup %711  ;;  %v273_v6 = vpop.permute.xlu1 %272 }
  0xb3   : > { %v714_v9 = vpop.eup %713  ;;  %335 = vmatpush.msra.mxu0 %v712_v2  ;;  %619 = vmatpush.msra.mxu2 %v712_v2  ;;  %v372_v42 = vpop.permute.xlu0 %371 }
  0xb4   : > { %v716_v10 = vpop.eup %715  ;;  %463 = vmatpush.msra.mxu1 %v714_v9  ;;  %626 = vmatpush.msra.mxu3 %v714_v9 }
  0xb5   : > { %v718_v13 = vpop.eup %717  ;;  %336 = vmatpush.msra.mxu0 %v716_v10  ;;  %620 = vmatpush.msra.mxu2 %v716_v10  ;;  %v376_v45 = vpop.permute.xlu2 %375 }
  0xb6   : > { %464 = vmatpush.msra.mxu1 %v718_v13  ;;  %627 = vmatpush.msra.mxu3 %v718_v13 }
  0xb7   : > { %594 = vmatmul.msk.f32.vlgmr.msra.gmra.mxu0 %vm299_vm0, %v176_v11  ;;  %597 = vmatmul.msk.f32.vlgmr.msra.gmra.mxu2 %vm299_vm0, %v179_v12 }
  0xb8   : > { %602 = vmatmul.msk.f32.vlgmr.msra.gmra.mxu1 %vm299_vm0, %v176_v11  ;;  %606 = vmatmul.msk.f32.vlgmr.msra.gmra.mxu3 %vm299_vm0, %v180_v5 }
  0xba   : > { %v285_v17 = vpop.permute.xlu1 %284 }
  0xbf   : > { %595 = vmatmul.msk.f32.gmra.mxu0 %vm299_vm0, %v177_v7  ;;  %598 = vmatmul.msk.f32.gmra.mxu2 %vm299_vm0, %v180_v5 }
  0xc0   : > { %603 = vmatmul.msk.f32.gmra.mxu1 %vm299_vm0, %v177_v7  ;;  %607 = vmatmul.msk.f32.gmra.mxu3 %vm299_vm0, %v181_v14  ;;  %v384_v7 = vpop.permute.xlu2 %383 }
  0xc2   : > { %v293_v24 = vpop.permute.xlu1 %292 }
  0xc7   : > { %596 = vmatmul.msk.f32.gmra.mxu0 %vm299_vm0, %v178_v0  ;;  %599 = vmatmul.msk.f32.gmra.mxu2 %vm299_vm0, %v181_v14 }
  0xc8   : > { %604 = vmatmul.msk.f32.gmra.mxu1 %vm299_vm0, %v178_v0  ;;  %608 = vmatmul.msk.f32.gmra.mxu3 %vm299_vm0, %v182_v15 }
  0xca   : > { %v297_v38 = vpop.permute.xlu1 %296 }
  0xcf   : > { %600 = vmatmul.msk.f32.gmra.mxu2 %vm299_vm0, %v182_v15 }
  0xd0   : > { %605 = vmatmul.msk.f32.gmra.mxu1 %vm299_vm0, %v179_v12 }
  0xd3   : > { %v380_v58 = vpop.permute.xlu1 %379 }
 0x134   : > { %v338_v18 = vpop.f32.mrf.mxu0 }
 0x135   : > { %v466_v19 = vpop.f32.mrf.mxu1  ;;  %v339_v4 = vadd.f32 %v338_v18, %v273_v6 }
 0x136   : > { %v467_v29 = vadd.f32 %v466_v19, %v273_v6  ;;  %v388_v6 = vpop.permute.xlu0 %387 }
 0x13a   : > { %v347_v21 = vpop.f32.mrf.mxu2 }
 0x13b   : > { %v478_v22 = vpop.f32.mrf.mxu3  ;;  %v348_v33 = vadd.f32 %v347_v21, %v285_v17 }
 0x13c   : > { %v341_v23 = vpop.f32.mrf.mxu0  ;;  %v479_v39 = vadd.f32 %v478_v22, %v289_v20 }
 0x13d   : > { %v342_v25 = vadd.f32 %v341_v23, %v277_v16  ;;  %v469_v26 = vpop.f32.mrf.mxu1  ;;  %v392_v23 = vpop.permute.xlu1 %391 }
 0x13e   : > { %v470_v31 = vadd.f32 %v469_v26, %v277_v16 }
 0x13f   : > { %719 = vtanh.f32 %v342_v25 }
 0x140   : > { %721 = vtanh.f32 %v339_v4 }
 0x141   : > { %723 = vtanh.f32 %v467_v29 }
 0x142   : > { %v350_v30 = vpop.f32.mrf.mxu2 }
 0x143   : > { %v481_v8 = vpop.f32.mrf.mxu3  ;;  %v351_v41 = vadd.f32 %v350_v30, %v289_v20 }
 0x144   : > { %v344_v32 = vpop.f32.mrf.mxu0  ;;  %v482_v53 = vadd.f32 %v481_v8, %v293_v24 }
 0x145   : > { %v345_v34 = vadd.f32 %v344_v32, %v281_v27  ;;  %v472_v35 = vpop.f32.mrf.mxu1  ;;  %v720_v37 = vpop.eup %719 }
 0x146   : > { %v473_v36 = vadd.f32 %v472_v35, %v281_v27  ;;  %v722_v40 = vpop.eup %721  ;;  %v395_v43 = vmul.f32 %v720_v37, %v372_v42 }
 0x147   : > { %725 = vtanh.f32 %v345_v34  ;;  %v724_v47 = vpop.eup %723  ;;  %v394_v48 = vmul.f32 %v722_v40, %v368_v28 }
 0x148   : > { %727 = vtanh.f32 %v470_v31  ;;  %v494_v10 = vmul.f32 %v724_v47, %v368_v28 }
 0x149   : > { %729 = vtanh.f32 %v348_v33  ;;  %v401_v54 = vadd.f32 %v395_v43, %v394_v48 }
 0x14a   : > { %731 = vtanh.f32 %v473_v36  ;;  %v353_v44 = vpop.f32.mrf.mxu2 }
 0x14b   : > { %v354_v46 = vadd.f32 %v353_v44, %v293_v24  ;;  %733 = vtanh.f32 %v479_v39  ;;  %v484_v50 = vpop.f32.mrf.mxu3 }
 0x14c   : > { %735 = vtanh.f32 %v351_v41  ;;  %v485_v60 = vadd.f32 %v484_v50, %v297_v38  ;;  %v415_v41 = vpop.permute.xlu2 %414 }
 0x14d   : > { %v726_v49 = vpop.eup %725  ;;  %v475_v51 = vpop.f32.mrf.mxu1  ;;  %737 = vtanh.f32 %v354_v46 }
 0x14e   : > { %v728_v52 = vpop.eup %727  ;;  %v396_v55 = vmul.f32 %v726_v49, %v376_v45  ;;  %v476_v56 = vadd.f32 %v475_v51, %v285_v17 }
 0x14f   : > { %v730_v57 = vpop.eup %729  ;;  %v495_v62 = vmul.f32 %v728_v52, %v372_v42 }
 0x150   : > { %v732_v59 = vpop.eup %731  ;;  %v402_v61 = vadd.f32 %v401_v54, %v396_v55  ;;  %739 = vtanh.f32 %v476_v56  ;;  %v397_v1 = vmul.f32 %v730_v57, %v380_v58 }
 0x151   : > { %v734_v63 = vpop.eup %733  ;;  %741 = vtanh.f32 %v482_v53  ;;  %v496_v11 = vmul.f32 %v732_v59, %v376_v45  ;;  %v501_v14 = vadd.f32 %v495_v62, %v494_v10 }
 0x152   : > { %v356_v2 = vpop.f32.mrf.mxu2  ;;  %v736_v9 = vpop.eup %735  ;;  %743 = vtanh.f32 %v485_v60  ;;  %v403_v13 = vadd.f32 %v402_v61, %v397_v1  ;;  %v498_v20 = vmul.f32 %v734_v63, %v384_v7 }
 0x153   : > { %v357_v12 = vadd.f32 %v356_v2, %v297_v38  ;;  %v738_v5 = vpop.eup %737  ;;  %v398_v0 = vmul.f32 %v736_v9, %v384_v7  ;;  %v502_v15 = vadd.f32 %v501_v14, %v496_v11  ;;  %v418_v38 = vlaneseq }
 0x154   : > { %v399_v18 = vmul.f32 %v738_v5, %v388_v6 }
 0x155   : > { %745 = vtanh.f32 %v357_v12  ;;  %v404_v19 = vadd.f32 %v403_v13, %v398_v0  ;;  %vm420_vm1 = vcmp.lt.s32.totalorder %v418_v38, 128 }
 0x156   : > { %v740_v3 = vpop.eup %739 }
 0x157   : > { %v497_v16 = vmul.f32 %v740_v3, %v380_v58  ;;  %v742_v17 = vpop.eup %741  ;;  %v405_v4 = vadd.f32 %v404_v19, %v399_v18 }
 0x158   : > { %v744_v22 = vpop.eup %743  ;;  %v499_v25 = vmul.f32 %v742_v17, %v388_v6 }
 0x159   : > { %v503_v21 = vadd.f32 %v502_v15, %v497_v16  ;;  %v500_v28 = vmul.f32 %v744_v22, %v392_v23 }
 0x15b   : > { %v746_v24 = vpop.eup %745  ;;  %v504_v26 = vadd.f32 %v503_v21, %v498_v20 }
 0x15c   : > { %v400_v27 = vmul.f32 %v746_v24, %v392_v23 }
 0x15d   : > { %v505_v29 = vadd.f32 %v504_v26, %v499_v25 }
 0x15e   : > { %v406_v30 = vadd.f32 %v405_v4, %v400_v27 }
 0x15f   : > { %v506_v8 = vadd.f32 %v505_v29, %v500_v28 }
 0x160   : > { %v407_v31 = vrot.slane %v406_v30, 4 }
 0x161   : > { %v507_v32 = vrot.slane %v506_v8, 4 }
 0x162   : > { %v408_v33 = vadd.f32 %v407_v31, %v406_v30 }
 0x163   : > { %v508_v34 = vadd.f32 %v507_v32, %v506_v8 }
 0x164   : > { %v409_v35 = vrot.slane %v408_v33, 2 }
 0x165   : > { %v509_v36 = vrot.slane %v508_v34, 2 }
 0x166   : > { %v410_v37 = vadd.f32 %v409_v35, %v408_v33 }
 0x167   : > { %v510_v39 = vadd.f32 %v509_v36, %v508_v34 }
 0x168   : > { %v411_v40 = vrot.slane %v410_v37, 1 }
 0x169   : > { %v511_v42 = vrot.slane %v510_v39, 1 }
 0x16a   : > { %v412_v43 = vadd.f32 %v411_v40, %v410_v37 }
 0x16b   : > { %v512_v44 = vadd.f32 %v511_v42, %v510_v39 }
 0x16c   : > { %v417_v45 = vadd.f32 %v415_v41, %v412_v43 }
 0x16d   : > { %v513_v46 = vadd.f32 %v512_v44, %v415_v41 }
 0x16e   : > { %422 = vst.msk [vmem:[%s162_s25] sm:$0x1] %vm420_vm1, %v417_v45 }
 0x16f   : > { %609 = vst.msk [vmem:[%s162_s25 + $0x1] sm:$0x1] %vm420_vm1, %v513_v46 }
 0x170   : > { %774 = shalt.err (!%p771_p3)
}
 0x171   : > { %628 = dma.vmem_to_hbm [thread:$0]  (%p871_p5), %s530_s27, 32, %s532_s28, %s517_s29  }
 0x172 PF: > { %p634_p4 = scmp.ge.s32.totalorder %s809_s15, 2  ;;  %s543_s9 = sand.u32 1, %s797_s12  }
 0x173   : > { %s544_s10 = scalar_lea.sflag [#allocation3], %s543_s9 }
 0x174   : > { %p631_p7 = pnand %p634_p4, %p875_p6 }
 0x176   : > { %p632_p8 = pneg %p631_p7 }
 0x178   : > { %792 = dma.done.wait (%p632_p8), %s544_s10, 32  }
 0x179   : > { %794 = vsyncadd (%p632_p8), %s544_s10, 4294967264  ;;  %p13_p9 = scmp.ge.s32.totalorder %s859_s18, 4   ;;  %s1043_s12 = smov %s801_s13 }
 0x17a   : > { %s1044_s13 = smov %s805_s14  ;;  %s1045_s14 = smov %s869_s21 }
 0x17b   : > { %s1046_s15 = smov %s859_s18  ;;  %15 = sbr.rel (!%p13_p9) target bundleno = 3 (0x3), region = 69 }
 0x180   :  { %550 = vsyncpa [#allocation3], 1 }
 0x181   :  { %552 = vsyncpa [#allocation3 + $0x1], 1 }

</bundles_post_ra>
